<compile_context>
chip_gen: v7x
topology: tpu7x:2x2x1
jax: 0.10.0
libtpu: 0.0.40
codegen_flags: <defaults>
</compile_context>

<pallas_src>
import functools

import jax
import jax.numpy as jnp
from jax.experimental import pallas as pl
from jax.experimental.pallas import tpu as pltpu

LEAKY_SLOPE = 0.01          # nn.LeakyReLU() default
LN_EPS = 1e-5               # nn.LayerNorm default eps
TK_MAX = 8192               # max reduction tile along D (multiple of 512)
SMALL_W1_BYTES = 2 * 1024 * 1024   # fast path when streamed W1 <= 2 MiB


def _round_up(x, m):
    return ((x + m - 1) // m) * m


def _epilogue_math(h, gamma, beta, w2_row, b2):
    """LeakyReLU -> LayerNorm(100) -> Linear(100,1) (VPU) -> Sigmoid.

    h, gamma, beta, w2_row: (1, HIDDEN) f32; b2: (1, 1) f32.  Returns (1, 1).
    """
    h = jnp.where(h >= 0, h, LEAKY_SLOPE * h)                       # LeakyReLU
    mean = jnp.mean(h, axis=-1, keepdims=True)                      # LayerNorm
    var = jnp.mean((h - mean) ** 2, axis=-1, keepdims=True)
    hn = (h - mean) * jax.lax.rsqrt(var + LN_EPS)
    hn = hn * gamma + beta
    # (1,100) @ (100,1) done on the VPU + lane reduce instead of the MXU.
    logit = jnp.sum(hn * w2_row, axis=-1, keepdims=True) + b2
    return jax.nn.sigmoid(logit)                                    # Sigmoid


# ---------------------------------------------------------------------------
# Fast path: whole W1 fits in VMEM -> single fused block, no grid.
# ---------------------------------------------------------------------------
def _fused_small_kernel(x_ref, w1_ref, b1_ref, g_ref, beta_ref, w2_ref, b2_ref,
                        o_ref):
    h = jnp.dot(x_ref[...], w1_ref[...],
                preferred_element_type=jnp.float32) + b1_ref[...]
    o_ref[...] = _epilogue_math(h, g_ref[...], beta_ref[...], w2_ref[...],
                                b2_ref[...]).astype(o_ref.dtype)


# ---------------------------------------------------------------------------
# Tiled path, stage 1: partial (1, TK) x (TK, 100) matmuls, accumulated in an
# f32 output block that stays resident in VMEM across the reduction axis.
# grid = (n_split, n_k); the leading axis is "parallel" (megacore on v7x).
# ---------------------------------------------------------------------------
def _partial_matmul_kernel(x_ref, w1_ref, o_ref):
    @pl.when(pl.program_id(1) == 0)
    def _():
        o_ref[...] = jnp.zeros_like(o_ref)

    o_ref[...] += jnp.dot(x_ref[...], w1_ref[...],
                          preferred_element_type=jnp.float32)[None]


# ---------------------------------------------------------------------------
# Tiled path, stage 2: combine per-core partials + fused epilogue.
# ---------------------------------------------------------------------------
def _epilogue_kernel(acc_ref, b1_ref, g_ref, beta_ref, w2_ref, b2_ref, o_ref):
    h = jnp.sum(acc_ref[...], axis=0) + b1_ref[...]       # (n_split,1,H)->(1,H)
    o_ref[...] = _epilogue_math(h, g_ref[...], beta_ref[...], w2_ref[...],
                                b2_ref[...]).astype(o_ref.dtype)


@functools.partial(jax.jit, static_argnames=("stream_dtype", "tk", "n_split"))
def discriminator_forward(x, w1, b1, gamma, beta, w2, b2, *,
                          stream_dtype=jnp.float32, tk=None, n_split=None):
    """Forward pass of the Discriminator.

    x: image of any shape with prod(shape) == D (flattened like torch .view).
    w1: (D, HIDDEN), b1/gamma/beta: (HIDDEN,) or (1, HIDDEN),
    w2: (HIDDEN, 1) or (1, HIDDEN), b2: scalar-shaped.
    stream_dtype: dtype used to stream x/W1 from HBM (jnp.bfloat16 ~2x faster,
                  accumulation stays f32).  Default f32 == exact torch math.
    """
    d, hidden = w1.shape
    x_row = x.reshape(1, d).astype(stream_dtype)
    w1s = w1.astype(stream_dtype)
    b1 = b1.reshape(1, hidden).astype(jnp.float32)
    gamma = gamma.reshape(1, hidden).astype(jnp.float32)
    beta = beta.reshape(1, hidden).astype(jnp.float32)
    w2_row = w2.reshape(1, hidden).astype(jnp.float32)
    b2 = b2.reshape(1, 1).astype(jnp.float32)

    w1_bytes = d * hidden * jnp.dtype(stream_dtype).itemsize

    # ---------------- fast path: single fused block ----------------
    if w1_bytes <= SMALL_W1_BYTES:
        out = pl.pallas_call(
            _fused_small_kernel,
            out_shape=jax.ShapeDtypeStruct((1, 1), jnp.float32),
        )(x_row, w1s, b1, gamma, beta, w2_row, b2)
        return out.reshape(1)

    # ---------------- tiled path: big reduction tiles ----------------
    if n_split is None:
        n_split = 2                      # ~2x on v7x megacore, harmless on 1-TC
    per_split = -(-d // n_split)
    if tk is None:
        tk = min(TK_MAX, _round_up(per_split, 512))
    per_split_pad = _round_up(per_split, tk)
    d_pad = n_split * per_split_pad
    if d_pad != d:                       # zero rows contribute nothing
        x_row = jnp.pad(x_row, ((0, 0), (0, d_pad - d)))
        w1s = jnp.pad(w1s, ((0, d_pad - d), (0, 0)))
    n_k = per_split_pad // tk

    partials = pl.pallas_call(
        _partial_matmul_kernel,
        out_shape=jax.ShapeDtypeStruct((n_split, 1, hidden), jnp.float32),
        grid_spec=pltpu.PrefetchScalarGridSpec(
            num_scalar_prefetch=0,
            grid=(n_split, n_k),
            in_specs=[
                pl.BlockSpec((1, tk), lambda c, k: (0, c * n_k + k)),       # x
                pl.BlockSpec((tk, hidden), lambda c, k: (c * n_k + k, 0)),  # W1
            ],
            out_specs=pl.BlockSpec((1, 1, hidden), lambda c, k: (c, 0, 0)),
        ),
        compiler_params=pltpu.CompilerParams(
            dimension_semantics=("parallel", "arbitrary")),
    )(x_row, w1s)

    out = pl.pallas_call(
        _epilogue_kernel,
        out_shape=jax.ShapeDtypeStruct((1, 1), jnp.float32),
    )(partials, b1, gamma, beta, w2_row, b2)

    # torch: 1-D input of size D -> output shape (1,)
    return out.reshape(1)


def _reference_forward(x, w1, b1, gamma, beta, w2, b2,
                       stream_dtype=jnp.float32):
    d, hidden = w1.shape
    xr = x.reshape(1, d).astype(stream_dtype)
    h = jnp.dot(xr, w1.astype(stream_dtype),
                preferred_element_type=jnp.float32)
    h = h + b1.reshape(1, hidden).astype(jnp.float32)
    h = jnp.where(h >= 0, h, LEAKY_SLOPE * h)
    mean = jnp.mean(h, axis=-1, keepdims=True)
    var = jnp.mean((h - mean) ** 2, axis=-1, keepdims=True)
    hn = (h - mean) * jax.lax.rsqrt(var + LN_EPS)
    hn = hn * gamma.reshape(1, hidden) + beta.reshape(1, hidden)
    logit = jnp.sum(hn * w2.reshape(1, hidden), axis=-1,
                    keepdims=True) + b2.reshape(1, 1)
    return jax.nn.sigmoid(logit).reshape(1)


if __name__ == "__main__":
    # NOTE: original inputsize is [218, 178, 3]; scaled-down shapes used here.
    # TODO(synk): BCELoss / Adam / training loop have no Pallas equivalent here;
    # only the forward pass is implemented.
    HIDDEN = 100
    key = jax.random.PRNGKey(0)

    def make_inputs(subkey, img_shape):
        d = img_shape[0] * img_shape[1] * img_shape[2]
        kx, kw1, kb1, kw2, kb2 = jax.random.split(subkey, 5)
        lim1 = 1.0 / jnp.sqrt(jnp.float32(d))
        lim2 = 1.0 / jnp.sqrt(jnp.float32(HIDDEN))
        x = jax.random.normal(kx, img_shape, jnp.float32)
        w1 = jax.random.uniform(kw1, (d, HIDDEN), jnp.float32, -lim1, lim1)
        b1 = jax.random.uniform(kb1, (1, HIDDEN), jnp.float32, -lim1, lim1)
        g = jnp.ones((1, HIDDEN), jnp.float32)
        bt = jnp.zeros((1, HIDDEN), jnp.float32)
        w2 = jax.random.uniform(kw2, (HIDDEN, 1), jnp.float32, -lim2, lim2)
        b2 = jax.random.uniform(kb2, (1, 1), jnp.float32, -lim2, lim2)
        return x, w1, b1, g, bt, w2, b2

    # (image shape, kwargs) — covers: small fused fast path (f32 & bf16),
    # tiled path with multi-step reduction (bf16), tiled path with D padding
    # and default f32 streaming.
    cases = [
        ((16, 8, 3), dict()),                                     # D=384, fast
        ((16, 8, 3), dict(stream_dtype=jnp.bfloat16)),            # fast, bf16
        ((64, 64, 3), dict(stream_dtype=jnp.bfloat16, tk=1024)),  # D=12288 tiled
        ((60, 67, 3), dict()),                                    # D=12060 tiled
    ]

    for i, (img_shape, kw) in enumerate(cases):
        sub = jax.random.fold_in(key, i)
        x, w1, b1, g, bt, w2, b2 = make_inputs(sub, img_shape)

        out = discriminator_forward(x, w1, b1, g, bt, w2, b2, **kw)
        jax.block_until_ready(out)

        ref = _reference_forward(
            x, w1, b1, g, bt, w2, b2,
            stream_dtype=kw.get("stream_dtype", jnp.float32))

        assert out.shape == (1,), (i, out.shape)
        assert jnp.allclose(out, ref, rtol=1e-4, atol=1e-5), (i, out, ref)

    print("KERNEL_OK")
</pallas_src>

<mosaic_0001>
module attributes {stable_mosaic.version = 11 : i64} {
  func.func @_fused_small_kernel(%arg0: memref<1x384xf32, #tpu.memory_space<vmem>>, %arg1: memref<384x100xf32, #tpu.memory_space<vmem>>, %arg2: memref<1x100xf32, #tpu.memory_space<vmem>>, %arg3: memref<1x100xf32, #tpu.memory_space<vmem>>, %arg4: memref<1x100xf32, #tpu.memory_space<vmem>>, %arg5: memref<1x100xf32, #tpu.memory_space<vmem>>, %arg6: memref<1x1xf32, #tpu.memory_space<vmem>>, %arg7: memref<1x1xf32, #tpu.memory_space<vmem>>) attributes {dimension_semantics = [], scalar_prefetch = 0 : i64, scratch_operands = 0 : i64, tpu.core_type = #tpu.core_type<tc>} {
    %c0 = arith.constant 0 : index
    %c0_0 = arith.constant 0 : index
    %0 = vector.load %arg0[%c0, %c0_0] : memref<1x384xf32, #tpu.memory_space<vmem>>, vector<1x384xf32>
    %c0_1 = arith.constant 0 : index
    %c0_2 = arith.constant 0 : index
    %1 = vector.load %arg1[%c0_1, %c0_2] : memref<384x100xf32, #tpu.memory_space<vmem>>, vector<384x100xf32>
    %cst = arith.constant dense<0.000000e+00> : vector<1x100xf32>
    %2 = tpu.matmul %0, %1, %cst {dimension_numbers = #tpu.dot_dimension_numbers<[1], [0], [0], [1], [0, 0, 1, 1], [], []>} : vector<1x384xf32>, vector<384x100xf32>, vector<1x100xf32> -> vector<1x100xf32>
    %c0_3 = arith.constant 0 : index
    %c0_4 = arith.constant 0 : index
    %3 = vector.load %arg2[%c0_3, %c0_4] : memref<1x100xf32, #tpu.memory_space<vmem>>, vector<1x100xf32>
    %4 = arith.addf %2, %3 : vector<1x100xf32>
    %c0_5 = arith.constant 0 : index
    %c0_6 = arith.constant 0 : index
    %5 = vector.load %arg3[%c0_5, %c0_6] : memref<1x100xf32, #tpu.memory_space<vmem>>, vector<1x100xf32>
    %c0_7 = arith.constant 0 : index
    %c0_8 = arith.constant 0 : index
    %6 = vector.load %arg4[%c0_7, %c0_8] : memref<1x100xf32, #tpu.memory_space<vmem>>, vector<1x100xf32>
    %c0_9 = arith.constant 0 : index
    %c0_10 = arith.constant 0 : index
    %7 = vector.load %arg5[%c0_9, %c0_10] : memref<1x100xf32, #tpu.memory_space<vmem>>, vector<1x100xf32>
    %c0_11 = arith.constant 0 : index
    %c0_12 = arith.constant 0 : index
    %8 = vector.load %arg6[%c0_11, %c0_12] : memref<1x1xf32, #tpu.memory_space<vmem>>, vector<1x1xf32>
    %cst_13 = arith.constant 0.000000e+00 : f32
    %9 = vector.broadcast %cst_13 : f32 to vector<1x100xf32>
    %10 = arith.cmpf oge, %4, %9 : vector<1x100xf32>
    %cst_14 = arith.constant 0.00999999977 : f32
    %11 = vector.broadcast %cst_14 : f32 to vector<1x100xf32>
    %12 = arith.mulf %11, %4 : vector<1x100xf32>
    %13 = arith.select %10, %4, %12 : vector<1x100xi1>, vector<1x100xf32>
    %cst_15 = arith.constant dense<0.000000e+00> : vector<1xf32>
    %14 = vector.multi_reduction <add>, %13, %cst_15 [1] : vector<1x100xf32> to vector<1xf32>
    %15 = vector.shape_cast %14 : vector<1xf32> to vector<1x1xf32>
    %cst_16 = arith.constant 1.000000e+02 : f32
    %16 = vector.broadcast %cst_16 : f32 to vector<1x1xf32>
    %17 = arith.divf %15, %16 : vector<1x1xf32>
    %18 = vector.broadcast %17 : vector<1x1xf32> to vector<1x100xf32>
    %19 = arith.subf %13, %18 : vector<1x100xf32>
    %20 = arith.mulf %19, %19 : vector<1x100xf32>
    %cst_17 = arith.constant dense<0.000000e+00> : vector<1xf32>
    %21 = vector.multi_reduction <add>, %20, %cst_17 [1] : vector<1x100xf32> to vector<1xf32>
    %22 = vector.shape_cast %21 : vector<1xf32> to vector<1x1xf32>
    %cst_18 = arith.constant 1.000000e+02 : f32
    %23 = vector.broadcast %cst_18 : f32 to vector<1x1xf32>
    %24 = arith.divf %22, %23 : vector<1x1xf32>
    %25 = vector.broadcast %17 : vector<1x1xf32> to vector<1x100xf32>
    %26 = arith.subf %13, %25 : vector<1x100xf32>
    %cst_19 = arith.constant 9.99999974E-6 : f32
    %27 = vector.broadcast %cst_19 : f32 to vector<1x1xf32>
    %28 = arith.addf %24, %27 : vector<1x1xf32>
    %29 = math.rsqrt %28 : vector<1x1xf32>
    %30 = vector.broadcast %29 : vector<1x1xf32> to vector<1x100xf32>
    %31 = arith.mulf %26, %30 : vector<1x100xf32>
    %32 = arith.mulf %31, %5 : vector<1x100xf32>
    %33 = arith.addf %32, %6 : vector<1x100xf32>
    %34 = arith.mulf %33, %7 : vector<1x100xf32>
    %cst_20 = arith.constant dense<0.000000e+00> : vector<1xf32>
    %35 = vector.multi_reduction <add>, %34, %cst_20 [1] : vector<1x100xf32> to vector<1xf32>
    %36 = vector.shape_cast %35 : vector<1xf32> to vector<1x1xf32>
    %37 = arith.addf %36, %8 : vector<1x1xf32>
    %38 = arith.negf %37 : vector<1x1xf32>
    %39 = math.exp %38 : vector<1x1xf32>
    %cst_21 = arith.constant 1.000000e+00 : f32
    %40 = vector.broadcast %cst_21 : f32 to vector<1x1xf32>
    %41 = arith.addf %40, %39 : vector<1x1xf32>
    %42 = arith.divf %40, %41 : vector<1x1xf32>
    %c0_22 = arith.constant 0 : index
    %c0_23 = arith.constant 0 : index
    %43 = vector.load %arg7[%c0_22, %c0_23] : memref<1x1xf32, #tpu.memory_space<vmem>>, vector<1x1xf32>
    tpu.vector_store %arg7[%c0_22, %c0_23], %42 {strides = array<i32>} : memref<1x1xf32, #tpu.memory_space<vmem>>, vector<1x1xf32>,
    return
  }
}

</mosaic_0001>

<bundles_post_ra>
// kernel: discriminator_forward.1
= control target key start
LH: loop header
LB: loop body
LE: loop exit
PB: predicated region body
PF: predicated region fallthrough
CT: control target
= control target key end

     0   :  { %s698_s0 = inlined_call_operand.vmem [shape: f32[1,384], index: 0, kind: input, shape index: {}]   ;;  %s699_s1 = inlined_call_operand.vmem [shape: f32[384,100], index: 1, kind: input, shape index: {}]   ;;  %s700_s2 = inlined_call_operand.vmem [shape: f32[1,100], index: 2, kind: input, shape index: {}]   ;;  %s701_s3 = inlined_call_operand.vmem [shape: f32[1,100], index: 3, kind: input, shape index: {}]   ;;  %s702_s4 = inlined_call_operand.vmem [shape: f32[1,100], index: 4, kind: input, shape index: {}]   ;;  %s703_s5 = inlined_call_operand.vmem [shape: f32[1,100], index: 5, kind: input, shape index: {}]   ;;  %s704_s6 = inlined_call_operand.<no memory space> [shape: f32[1,1], index: 6, kind: input, shape index: {}]   ;;  %s705_s7 = inlined_call_operand.hbm [shape: f32[1,1], index: 7, kind: output, shape index: {}]  }
   0x1   :  { %v12_v0 = vstv %s704_s6 }
   0x2   :  { %13 = vst [vmem:[#allocation2] sm:$0x1] %v12_v0 }
   0x3   :  { %v46_v1 = vld [vmem:[%s699_s1 + $0x80] sm:$0xff]  ;;  %v47_v2 = vld [vmem:[%s699_s1 + $0x88] sm:$0xff]  ;;  %v48_v6 = vld [vmem:[%s699_s1 + $0x90] sm:$0xff]  ;;  %v464_v8 = vmov 0.0|0.0   ;;  %vm465_vm0 = vmmov 0   ;;  %v466_v9 = vmov 0.0   ;;  %v80_v21 = vlaneseq }
   0x4   :  { %v30_v3 = vld [vmem:[%s699_s1] sm:$0xff]  ;;  %v374_v4 = vpack.c.bf16 %v47_v2, %v46_v1  ;;  %v31_v5 = vld [vmem:[%s699_s1 + $0x8] sm:$0xff]  ;;  %v49_v7 = vld [vmem:[%s699_s1 + $0x98] sm:$0xff]  ;;  %406 = vmatprep.subr.bf16.mxu1 %v464_v8  ;;  %371 = vmatprep.mubr.msk.f32.mxu1 %vm465_vm0, %v466_v9 }
   0x5   :  { %v376_v10 = vpack.c.bf16 %v31_v5, %v30_v3  ;;  %v378_v11 = vpack.c.bf16 %v49_v7, %v48_v6  ;;  %v32_v12 = vld [vmem:[%s699_s1 + $0x10] sm:$0xff]  ;;  %v33_v13 = vld [vmem:[%s699_s1 + $0x18] sm:$0xff]  ;;  %v62_v14 = vld [vmem:[%s699_s1 + $0x100] sm:$0xff]  ;;  %v573_v32 = vshrl.u32 %v80_v21, 7 }
   0x6   :  { %375 = vmatprep.subr.bf16.mxu0 %v374_v4  ;;  %v63_v15 = vld [vmem:[%s699_s1 + $0x108] sm:$0xff]  ;;  %v50_v16 = vld [vmem:[%s699_s1 + $0xa0] sm:$0xff]  ;;  %v380_v18 = vpack.c.bf16 %v33_v13, %v32_v12  ;;  %v64_v20 = vld [vmem:[%s699_s1 + $0x110] sm:$0xff] }
   0x7   :  { %v51_v17 = vld [vmem:[%s699_s1 + $0xa8] sm:$0xff]  ;;  %377 = vmatpush3.bf16.msra.mxu0 %v376_v10  ;;  %v407_v19 = vpack.c.bf16 %v63_v15, %v62_v14  ;;  %v34_v23 = vld [vmem:[%s699_s1 + $0x20] sm:$0xff]  ;;  %v65_v25 = vld [vmem:[%s699_s1 + $0x118] sm:$0xff]  ;;  %v86_v42 = vsub.s32 1, %v573_v32 }
   0x8   :  { %379 = vmatprep.subr.bf16.mxu0 %v378_v11  ;;  %v382_v22 = vpack.c.bf16 %v51_v17, %v50_v16  ;;  %v35_v24 = vld [vmem:[%s699_s1 + $0x28] sm:$0xff]  ;;  %v410_v26 = vpack.c.bf16 %v65_v25, %v64_v20  ;;  %v52_v27 = vld [vmem:[%s699_s1 + $0xb0] sm:$0xff]  ;;  %v53_v28 = vld [vmem:[%s699_s1 + $0xb8] sm:$0xff] }
   0x9   :  { %408 = vmatpush3.bf16.msra.mxu1 %v407_v19  ;;  %v66_v29 = vld [vmem:[%s699_s1 + $0x120] sm:$0xff]  ;;  %v67_v30 = vld [vmem:[%s699_s1 + $0x128] sm:$0xff]  ;;  %v384_v31 = vpack.c.bf16 %v35_v24, %v34_v23  ;;  %v386_v33 = vpack.c.bf16 %v53_v28, %v52_v27  ;;  %v36_v34 = vld [vmem:[%s699_s1 + $0x30] sm:$0xff] }
   0xa   :  { %409 = vmatprep.subr.bf16.mxu1 %v464_v8  ;;  %v37_v35 = vld [vmem:[%s699_s1 + $0x38] sm:$0xff]  ;;  %v413_v36 = vpack.c.bf16 %v67_v30, %v66_v29  ;;  %v54_v37 = vld [vmem:[%s699_s1 + $0xc0] sm:$0xff]  ;;  %v55_v38 = vld [vmem:[%s699_s1 + $0xc8] sm:$0xff] }
   0xb   :  { %381 = vmatpush3.bf16.msra.mxu0 %v380_v18  ;;  %v68_v39 = vld [vmem:[%s699_s1 + $0x130] sm:$0xff]  ;;  %v69_v40 = vld [vmem:[%s699_s1 + $0x138] sm:$0xff]  ;;  %v388_v41 = vpack.c.bf16 %v37_v35, %v36_v34  ;;  %v390_v43 = vpack.c.bf16 %v55_v38, %v54_v37  ;;  %v38_v44 = vld [vmem:[%s699_s1 + $0x40] sm:$0xff] }
   0xc   :  { %383 = vmatprep.subr.bf16.mxu0 %v382_v22  ;;  %v39_v45 = vld [vmem:[%s699_s1 + $0x48] sm:$0xff]  ;;  %v416_v46 = vpack.c.bf16 %v69_v40, %v68_v39  ;;  %v56_v47 = vld [vmem:[%s699_s1 + $0xd0] sm:$0xff]  ;;  %v57_v48 = vld [vmem:[%s699_s1 + $0xd8] sm:$0xff] }
   0xd   :  { %411 = vmatpush3.bf16.msra.mxu1 %v410_v26  ;;  %v70_v49 = vld [vmem:[%s699_s1 + $0x140] sm:$0xff]  ;;  %v71_v50 = vld [vmem:[%s699_s1 + $0x148] sm:$0xff]  ;;  %v392_v52 = vpack.c.bf16 %v39_v45, %v38_v44 }
   0xe   :  { %412 = vmatprep.subr.bf16.mxu1 %v464_v8  ;;  %v29_v51 = vld [vmem:[%s698_s0] sm:$0x7] }
   0xf   :  { %385 = vmatpush3.bf16.msra.mxu0 %v384_v31  ;;  %v87_v53 = vrot.slane %v29_v51, %v86_v42 }
  0x10   :  { %387 = vmatprep.subr.bf16.mxu0 %v386_v33 }
  0x11   :  { %414 = vmatpush3.bf16.msra.mxu1 %v413_v36 }
  0x12   :  { %415 = vmatprep.subr.bf16.mxu1 %v464_v8 }
  0x13   :  { %389 = vmatpush3.bf16.msra.mxu0 %v388_v41 }
  0x14   :  { %14 = vsyncpa [#allocation4], 0  ;;  %391 = vmatprep.subr.bf16.mxu0 %v390_v43  ;;  %v394_v54 = vpack.c.bf16 %v57_v48, %v56_v47  ;;  %v40_v55 = vld [vmem:[%s699_s1 + $0x50] sm:$0xff]  ;;  %v41_v56 = vld [vmem:[%s699_s1 + $0x58] sm:$0xff]  ;;  %v419_v57 = vpack.c.bf16 %v71_v50, %v70_v49  ;;  %159 = vmatprep.mubr.f32.mxu0 %v87_v53  ;;  %v82_v13 = vsub.s32 0, %v573_v32  ;;  %v90_v17 = vsub.s32 2, %v573_v32 }
  0x15   :  { %417 = vmatpush3.bf16.msra.mxu1 %v416_v46  ;;  %v58_v58 = vld [vmem:[%s699_s1 + $0xe0] sm:$0xff]  ;;  %v59_v59 = vld [vmem:[%s699_s1 + $0xe8] sm:$0xff]  ;;  %v72_v60 = vld [vmem:[%s699_s1 + $0x150] sm:$0xff]  ;;  %v396_v62 = vpack.c.bf16 %v41_v56, %v40_v55  ;;  %vm242_vm2 = vcmask 811008   ;;  %vm270_vm3 = vcmask 0  }
  0x16   :  { %418 = vmatprep.subr.bf16.mxu1 %v464_v8  ;;  %v73_v61 = vld [vmem:[%s699_s1 + $0x158] sm:$0xff]  ;;  %v398_v63 = vpack.c.bf16 %v59_v59, %v58_v58  ;;  %v42_v0 = vld [vmem:[%s699_s1 + $0x60] sm:$0xff]  ;;  %v43_v1 = vld [vmem:[%s699_s1 + $0x68] sm:$0xff]  ;;  %v83_v19 = vrot.slane %v29_v51, %v82_v13  ;;  %v91_v20 = vrot.slane %v29_v51, %v90_v17 }
  0x17   :  { %393 = vmatpush3.bf16.msra.mxu0 %v392_v52  ;;  %v422_v2 = vpack.c.bf16 %v73_v61, %v72_v60  ;;  %v60_v3 = vld [vmem:[%s699_s1 + $0xf0] sm:$0xff]  ;;  %v61_v4 = vld [vmem:[%s699_s1 + $0xf8] sm:$0xff]  ;;  %v74_v5 = vld [vmem:[%s699_s1 + $0x160] sm:$0xff]  ;;  %v400_v7 = vpack.c.bf16 %v43_v1, %v42_v0 }
  0x18   :  { %395 = vmatprep.subr.bf16.mxu0 %v394_v54  ;;  %v75_v6 = vld [vmem:[%s699_s1 + $0x168] sm:$0xff]  ;;  %v402_v9 = vpack.c.bf16 %v61_v4, %v60_v3  ;;  %v44_v10 = vld [vmem:[%s699_s1 + $0x70] sm:$0xff]  ;;  %v45_v11 = vld [vmem:[%s699_s1 + $0x78] sm:$0xff] }
  0x19   :  { %420 = vmatpush3.bf16.msra.mxu1 %v419_v57  ;;  %v425_v12 = vpack.c.bf16 %v75_v6, %v74_v5  ;;  %v76_v14 = vld [vmem:[%s699_s1 + $0x170] sm:$0xff]  ;;  %v77_v15 = vld [vmem:[%s699_s1 + $0x178] sm:$0xff]  ;;  %v404_v16 = vpack.c.bf16 %v45_v11, %v44_v10  ;;  %v78_v23 = vld [vmem:[%s700_s2] sm:$0x1] }
  0x1a   :  { %421 = vmatprep.subr.bf16.mxu1 %v464_v8  ;;  %v428_v18 = vpack.c.bf16 %v77_v15, %v76_v14  ;;  %v235_v40 = vld [vmem:[%s701_s3] sm:$0x1]  ;;  %s467_s3 = smov [#allocation3]  }
  0x1b   :  { %397 = vmatpush3.bf16.msra.mxu0 %v396_v62  ;;  %v236_v42 = vld [vmem:[%s702_s4] sm:$0x1]  ;;  %s278_s4 = sshll.u32 %s467_s3, 4  ;;  %s279_s4 = int_to_ptr.vmem [resolvable:$true] %s278_s4 }
  0x1c   :  { %399 = vmatprep.subr.bf16.mxu0 %v398_v63  ;;  %v237_v44 = vld [vmem:[%s703_s5] sm:$0x1]  ;;  %s440_s5 = scalar_lea.vmem %s279_s4, 16  ;;  %s444_s9 = scalar_lea.vmem %s279_s4, 32 }
  0x1d   :  { %423 = vmatpush3.bf16.msra.mxu1 %v422_v2  ;;  %v238_v48 = vld [vmem:[#allocation2] sm:$0x1]  ;;  %p441_p0 = scmp.ne.s32.totalorder %s279_s4, %s440_s5  ;;  %p445_p1 = scmp.lt.s32.totalorder %s279_s4, %s279_s4 }
  0x1e   :  { %424 = vmatprep.subr.bf16.mxu1 %v464_v8  ;;  %p446_p2 = scmp.lt.s32.totalorder %s444_s9, %s440_s5 }
  0x1f   :  { %401 = vmatpush3.bf16.msra.mxu0 %v400_v7 }
  0x20   :  { %403 = vmatprep.subr.bf16.mxu0 %v402_v9  ;;  %p447_p3 = por %p446_p2, %p445_p1 }
  0x21   :  { %426 = vmatpush3.bf16.msra.mxu1 %v425_v12 }
  0x22   :  { %427 = vmatprep.subr.bf16.mxu1 %v464_v8  ;;  %p448_p4 = pnand %p447_p3, %p441_p0 }
  0x23   :  { %405 = vmatpush3.bf16.msra.mxu0 %v404_v16 }
  0x25   :  { %429 = vmatpush3.bf16.msra.mxu1 %v428_v18 }
  0x26   :  { %160 = vmatmul.mubr.f32.vlgmr.msra.gmra.mrb[0].mxu0 %v83_v19 }
  0x28   :  { %372 = vmatmul.mubr.f32.vlgmr.msra.gmra.mrb[0].mxu1 %v91_v20 }
  0xf9   :  { %v319_v21 = vpop.f32.mrb[0].mxu0 }
  0xfa   :  { %v320_v22 = vpop.f32.mrb[1].mxu0 }
  0xfb   :  { %v321_v24 = vadd.f32 %v320_v22, %v319_v21  ;;  %v231_v25 = vpop.f32.mrb[0].mxu1 }
  0xfc   :  { %v373_v26 = vpop.f32.mrb[1].mxu1 }
  0xfd   :  { %v162_v27 = vadd.f32 %v321_v24, %v78_v23 }
  0xff   :  { %v232_v28 = vadd.f32 %v231_v25, %v162_v27 }
 0x101   :  { %v240_v29 = vmul.f32 0.01, %v232_v28  ;;  %vm239_vm1 = vcmp.ge.f32.partialorder %v232_v28, 0.0 }
 0x103   :  { %v241_v8 = vsel %vm239_vm1, %v232_v28, %v240_v29 }
 0x104   :  { %v243_v30 = vsel %vm242_vm2, %v241_v8, 0.0 }
 0x105   :  { %244 = vadd.xlane.f32.xlu0 %v243_v30 }
 0x192   :  { %v245_v31 = vpop.xlane.xlu0 %244 }
 0x193   :  { %v247_v32 = vmul.f32 0.01, %v245_v31 }
 0x195   :  { %v248_v33 = vsub.f32 %v241_v8, %v247_v32 }
 0x197   :  { %v249_v34 = vmul.f32 %v248_v33, %v248_v33 }
 0x199   :  { %v250_v35 = vsel %vm242_vm2, %v249_v34, 0.0 }
 0x19a   :  { %251 = vadd.xlane.f32.xlu0 %v250_v35 }
 0x227   :  { %v252_v36 = vpop.xlane.xlu0 %251 }
 0x228   :  { %v253_v37 = vmul.f32 0.01, %v252_v36 }
 0x22a   :  { %v254_v38 = vadd.f32 1e-05, %v253_v37 }
 0x22c   :  { %434 = vrsqrt.f32 %v254_v38 }
 0x236   :  { %v435_v39 = vpop.eup %434 }
 0x237   :  { %v256_v41 = vmul.f32 %v435_v39, %v248_v33 }
 0x239   :  { %v257_v43 = vmul.f32 %v256_v41, %v235_v40 }
 0x23b   :  { %v258_v45 = vadd.f32 %v257_v43, %v236_v42 }
 0x23d   :  { %v259_v46 = vmul.f32 %v258_v45, %v237_v44 }
 0x23f   :  { %v260_v47 = vsel %vm242_vm2, %v259_v46, 0.0 }
 0x240   :  { %261 = vadd.xlane.f32.xlu1 %v260_v47 }
 0x2cd   :  { %v262_v49 = vpop.xlane.xlu1 %261 }
 0x2ce   :  { %v263_v50 = vadd.f32 %v262_v49, %v238_v48 }
 0x2d0   :  { %v286_v51 = vmul.f32 -1.442695, %v263_v50 }
 0x2d2   :  { %436 = vpow2.f32 %v286_v51 }
 0x2dc   :  { %v437_v52 = vpop.eup %436 }
 0x2dd   :  { %v267_v53 = vadd.f32 1.0, %v437_v52 }
 0x2df   :  { %438 = vrcp.f32 %v267_v53 }
 0x2e9   :  { %v439_v54 = vpop.eup %438 }
 0x2ea   :  { %271 = vst.msk [vmem:[#allocation3] sm:$0x1] %vm270_vm3, %v439_v54 }
 0x2eb   :  { %451 = shalt.err (!%p448_p4)
}
 0x2ec   :  { %s452_s6 = scalar_lea.hbm %s705_s7, 16 }
 0x2ed   :  { %p453_p5 = scmp.ne.s32.totalorder %s705_s7, %s452_s6  ;;  %p456_p6 = scmp.lt.u32.totalorder %s452_s6, %s705_s7 }
 0x2ef   :  { %p458_p7 = pnand %p456_p6, %p453_p5 }
 0x2f1   :  { %461 = shalt.err (!%p458_p7)
}
 0x2f2   :  { %281 = dma.vmem_to_hbm [thread:$0]  %s279_s4, 16, %s705_s7, [#allocation4]  }
 0x2f3   :  { %462 = dma.done.wait [#allocation4], 16  }
 0x2f4   :  { %463 = vsyncadd [#allocation4], 4294967280 }
 0x2f5   :  { %285 = vsyncpa [#allocation4], 1 }

</bundles_post_ra>
